<compile_context>
chip_gen: v5e
topology: v5e:2x2
jax: 0.10.0
libtpu: 0.0.40
codegen_flags: <defaults>
</compile_context>

<pallas_src>
import math
from functools import partial

import jax
import jax.numpy as jnp
from jax import lax
from jax.experimental import pallas as pl
from jax.experimental.pallas import tpu as pltpu


# ----------------------------------------------------------------------------- #
# Pallas kernel: one grid cell == (one sample, one lane-tile of H*W).
# The full num_steps Euler loop runs in-kernel over the VMEM-resident
# per-step augmented weight stack.
# ----------------------------------------------------------------------------- #
def _veuler_tile_kernel(noise_ref, w_ref, out_ref):
    C, T = noise_ref.shape            # (C, tile)     state tile
    S, CP, _ = w_ref.shape            # (steps, CP, CP) folded per-step weights

    # Augment the state once per tile: [x ; ones ; zero-pad]  -> (CP, T).
    # The ones row absorbs the per-step bias into the matmul; pad rows stay 0.
    parts = [noise_ref[...].astype(jnp.float32),
             jnp.ones((1, T), jnp.float32)]
    if CP > C + 1:
        parts.append(jnp.zeros((CP - C - 1, T), jnp.float32))
    x = jnp.concatenate(parts, axis=0)

    def body(i, x):
        # One fused Euler step: x <- W_aug_i @ x   (MXU, f32 accumulation)
        return jnp.dot(w_ref[i], x, preferred_element_type=jnp.float32)

    x = lax.fori_loop(0, S, body, x, unroll=True)

    # clamp once, after the last step; drop the augmented/pad rows
    out_ref[...] = jnp.clip(x[:C, :], -1.0, 1.0).astype(out_ref.dtype)


# ----------------------------------------------------------------------------- #
# Host-side schedule math (folded into per-step matrices) + pallas_call wrapper
# ----------------------------------------------------------------------------- #
def _shifted_cosine_transform(t, logsnr_min, logsnr_max, shift):
    t_min = math.atan(math.exp(-0.5 * logsnr_max))
    t_max = math.atan(math.exp(-0.5 * logsnr_min))
    return -2.0 * jnp.log(jnp.tan(t_min + t * (t_max - t_min))) + 2.0 * shift


def _round_up(x, m):
    return ((x + m - 1) // m) * m


@partial(jax.jit,
         static_argnames=("logsnr_min", "logsnr_max", "shift", "num_steps"))
def _veuler_sample_impl(noise_nchw, w, b, sigmas, *, logsnr_min, logsnr_max,
                        shift, num_steps):
    N, C, H, W = noise_nchw.shape
    HW = H * W
    S = num_steps
    CP = max(8, _round_up(C + 1, 8))        # channels + ones-row, sublane aligned

    # ---- lane tiling: biggest tile that fits a conservative VMEM budget ----- #
    # live bytes/lane ~ 2x2 dbl-buffered in/out blocks (C rows) + ~3 CP-row temps
    budget = 24 * 1024 * 1024
    bytes_per_lane = 4 * (4 * C + 3 * CP)
    tile_max = max(128, min(64 * 1024, (budget // bytes_per_lane) // 128 * 128))
    if HW <= tile_max:
        tile, HWP = HW, HW                  # full-extent block: no (8,128) pad
    else:
        tile = tile_max
        HWP = _round_up(HW, tile)
    n_tiles = HWP // tile

    # state as (N, C, H*W) — a free reshape of NCHW (no transpose pass)
    x0 = noise_nchw.reshape(N, C, HW).astype(jnp.float32)
    if HWP != HW:
        x0 = jnp.pad(x0, ((0, 0), (0, 0), (0, HWP - HW)))

    # ---- fold the whole per-step schedule + net affine into W_aug ---------- #
    sigmas_ext = jnp.concatenate(
        [sigmas.astype(jnp.float32), jnp.zeros((1,), jnp.float32)])
    lt = _shifted_cosine_transform(sigmas_ext[:S], logsnr_min, logsnr_max, shift)
    ls = _shifted_cosine_transform(sigmas_ext[1:S + 1], logsnr_min, logsnr_max, shift)
    alpha_t = jnp.sqrt(jax.nn.sigmoid(lt))
    sigma_t = jnp.sqrt(jax.nn.sigmoid(-lt))
    # terminal step keyed on the step index (matches i == num_steps-1; the
    # appended sigma of exactly 0 makes this coincide with t_next == 0.0)
    is_last = jnp.arange(S) == (S - 1)
    coef_x = jnp.where(is_last, alpha_t, 1.0)
    coef_v = jnp.where(is_last, -sigma_t, -0.5 * (ls - lt) * alpha_t * sigma_t)

    wf = w.astype(jnp.float32)
    bf = b.astype(jnp.float32)
    eye = jnp.eye(C, dtype=jnp.float32)
    A = coef_x[:, None, None] * eye[None] + coef_v[:, None, None] * wf[None]
    bcol = coef_v[:, None] * bf[None, :]
    w_aug = jnp.zeros((S, CP, CP), jnp.float32)
    w_aug = w_aug.at[:, :C, :C].set(A)          # coef_x*I + coef_v*W
    w_aug = w_aug.at[:, :C, C].set(bcol)        # coef_v*b  (acts on the ones row)
    w_aug = w_aug.at[:, C, C].set(1.0)          # ones row maps to itself

    out = pl.pallas_call(
        _veuler_tile_kernel,
        out_shape=jax.ShapeDtypeStruct((N, C, HWP), jnp.float32),
        grid_spec=pltpu.PrefetchScalarGridSpec(
            num_scalar_prefetch=0,
            grid=(N, n_tiles),
            in_specs=[
                # state tile: (sample n, all channels, lane tile j)
                pl.BlockSpec((pl.Squeezed(), C, tile), lambda n, j: (n, 0, j)),
                # per-step folded weights, tiny, resident
                pl.BlockSpec((S, CP, CP), lambda n, j: (0, 0, 0)),
            ],
            out_specs=pl.BlockSpec((pl.Squeezed(), C, tile), lambda n, j: (n, 0, j)),
        ),
        compiler_params=pltpu.CompilerParams(
            dimension_semantics=("parallel", "parallel"),   # batch x lane tiles
            vmem_limit_bytes=32 * 1024 * 1024,              # safe on v5e/v6e/v7x
        ),
        input_output_aliases={0: 0},       # state is fully overwritten in place
    )(x0, w_aug)

    if HWP != HW:
        out = out[..., :HW]
    return out.reshape(N, C, H, W).astype(noise_nchw.dtype)


def veuler_sample_pallas(noise_nchw, w, b, sigmas, *, logsnr_min=-15.0,
                         logsnr_max=15.0, shift=0.5, num_steps=8):
    return _veuler_sample_impl(noise_nchw, w, b, sigmas,
                               logsnr_min=float(logsnr_min),
                               logsnr_max=float(logsnr_max),
                               shift=float(shift), num_steps=int(num_steps))


# ----------------------------------------------------------------------------- #
# Pure-JAX reference (mirrors the PyTorch module, NCHW)
# ----------------------------------------------------------------------------- #
def veuler_sample_reference(noise, w, b, sigmas, *, logsnr_min=-15.0,
                            logsnr_max=15.0, shift=0.5, num_steps=8):
    sigmas_ext = jnp.concatenate(
        [sigmas.astype(jnp.float32), jnp.zeros((1,), jnp.float32)])
    x = noise.astype(jnp.float32)
    for i in range(num_steps):
        t = sigmas_ext[i]
        t_next = sigmas_ext[i + 1]
        lt = _shifted_cosine_transform(t, logsnr_min, logsnr_max, shift)
        ls = _shifted_cosine_transform(t_next, logsnr_min, logsnr_max, shift)
        v = jnp.einsum("ck,nkhw->nchw", w, x) + b[None, :, None, None]
        alpha_t = jnp.sqrt(jax.nn.sigmoid(lt))
        sigma_t = jnp.sqrt(jax.nn.sigmoid(-lt))
        if i == num_steps - 1:  # terminal step (appended t_next == 0.0)
            x = alpha_t * x - sigma_t * v
        else:
            score = -alpha_t * sigma_t * v
            x = x + 0.5 * (ls - lt) * score
    return jnp.clip(x, -1.0, 1.0)


# ----------------------------------------------------------------------------- #
if __name__ == "__main__":
    N, C, H, W = 2, 4, 16, 16
    NUM_STEPS = 8

    key = jax.random.PRNGKey(0)
    k_noise, k_w, k_b = jax.random.split(key, 3)

    noise = jax.random.normal(k_noise, (N, C, H, W), dtype=jnp.float32)
    # deterministic synthetic "net" parameters (1x1 conv over channels)
    w_net = 0.1 * jax.random.normal(k_w, (C, C), dtype=jnp.float32)
    b_net = 0.01 * jax.random.normal(k_b, (C,), dtype=jnp.float32)
    # monotonically decreasing t values in (0, 1], as the sampler expects
    sigmas = jnp.linspace(1.0, 1.0 / NUM_STEPS, NUM_STEPS, dtype=jnp.float32)

    out = veuler_sample_pallas(noise, w_net, b_net, sigmas, num_steps=NUM_STEPS)
    out = jax.block_until_ready(out)

    ref = veuler_sample_reference(noise, w_net, b_net, sigmas, num_steps=NUM_STEPS)
    ref = jax.block_until_ready(ref)

    assert out.shape == (N, C, H, W)
    max_diff = float(jnp.max(jnp.abs(out - ref)))
    assert jnp.allclose(out, ref, rtol=2e-3, atol=2e-3), (
        f"max abs diff = {max_diff}")

    print("KERNEL_OK")
</pallas_src>

<mosaic_0001>
module attributes {stable_mosaic.version = 11 : i64} {
  func.func @_veuler_tile_kernel(%arg0: i32, %arg1: i32, %arg2: memref<1x4x256xf32, #tpu.memory_space<vmem>>, %arg3: memref<8x8x8xf32, #tpu.memory_space<vmem>>, %arg4: memref<1x4x256xf32, #tpu.memory_space<vmem>>) attributes {dimension_semantics = [#tpu.dimension_semantics<parallel>, #tpu.dimension_semantics<parallel>], iteration_bounds = array<i64: 2, 1>, scalar_prefetch = 0 : i64, scratch_operands = 0 : i64, tpu.core_type = #tpu.core_type<tc>, window_params = [{transform_indices = @transform_0, window_bounds = array<i64: 1, 4, 256>}, {pipeline_mode = #tpu.pipeline_mode<synchronous>, transform_indices = @transform_1, window_bounds = array<i64: 8, 8, 8>}, {transform_indices = @transform_2, window_bounds = array<i64: 1, 4, 256>}]} {
    %c0 = arith.constant 0 : index
    %c0_0 = arith.constant 0 : index
    %c0_1 = arith.constant 0 : index
    %0 = vector.load %arg2[%c0, %c0_0, %c0_1] : memref<1x4x256xf32, #tpu.memory_space<vmem>>, vector<1x4x256xf32>
    %1 = vector.shape_cast %0 : vector<1x4x256xf32> to vector<4x256xf32>
    %cst = arith.constant 1.000000e+00 : f32
    %2 = vector.broadcast %cst : f32 to vector<1x256xf32>
    %cst_2 = arith.constant 0.000000e+00 : f32
    %3 = vector.broadcast %cst_2 : f32 to vector<3x256xf32>
    %4 = tpu.concatenate %1, %2, %3 in 0 : vector<4x256xf32>, vector<1x256xf32>, vector<3x256xf32> -> vector<8x256xf32>
    %c0_i32 = arith.constant 0 : i32
    %5 = arith.index_cast %c0_i32 : i32 to index
    %c0_3 = arith.constant 0 : index
    %c0_4 = arith.constant 0 : index
    %6 = vector.load %arg3[%5, %c0_3, %c0_4] : memref<8x8x8xf32, #tpu.memory_space<vmem>>, vector<1x8x8xf32>
    %7 = vector.shape_cast %6 : vector<1x8x8xf32> to vector<8x8xf32>
    %cst_5 = arith.constant dense<0.000000e+00> : vector<8x256xf32>
    %8 = tpu.matmul %7, %4, %cst_5 {dimension_numbers = #tpu.dot_dimension_numbers<[1], [0], [0], [1], [0, 0, 1, 1], [], []>} : vector<8x8xf32>, vector<8x256xf32>, vector<8x256xf32> -> vector<8x256xf32>
    %c1_i32 = arith.constant 1 : i32
    %9 = arith.index_cast %c1_i32 : i32 to index
    %c0_6 = arith.constant 0 : index
    %c0_7 = arith.constant 0 : index
    %10 = vector.load %arg3[%9, %c0_6, %c0_7] : memref<8x8x8xf32, #tpu.memory_space<vmem>>, vector<1x8x8xf32>
    %11 = vector.shape_cast %10 : vector<1x8x8xf32> to vector<8x8xf32>
    %cst_8 = arith.constant dense<0.000000e+00> : vector<8x256xf32>
    %12 = tpu.matmul %11, %8, %cst_8 {dimension_numbers = #tpu.dot_dimension_numbers<[1], [0], [0], [1], [0, 0, 1, 1], [], []>} : vector<8x8xf32>, vector<8x256xf32>, vector<8x256xf32> -> vector<8x256xf32>
    %c2_i32 = arith.constant 2 : i32
    %13 = arith.index_cast %c2_i32 : i32 to index
    %c0_9 = arith.constant 0 : index
    %c0_10 = arith.constant 0 : index
    %14 = vector.load %arg3[%13, %c0_9, %c0_10] : memref<8x8x8xf32, #tpu.memory_space<vmem>>, vector<1x8x8xf32>
    %15 = vector.shape_cast %14 : vector<1x8x8xf32> to vector<8x8xf32>
    %cst_11 = arith.constant dense<0.000000e+00> : vector<8x256xf32>
    %16 = tpu.matmul %15, %12, %cst_11 {dimension_numbers = #tpu.dot_dimension_numbers<[1], [0], [0], [1], [0, 0, 1, 1], [], []>} : vector<8x8xf32>, vector<8x256xf32>, vector<8x256xf32> -> vector<8x256xf32>
    %c3_i32 = arith.constant 3 : i32
    %17 = arith.index_cast %c3_i32 : i32 to index
    %c0_12 = arith.constant 0 : index
    %c0_13 = arith.constant 0 : index
    %18 = vector.load %arg3[%17, %c0_12, %c0_13] : memref<8x8x8xf32, #tpu.memory_space<vmem>>, vector<1x8x8xf32>
    %19 = vector.shape_cast %18 : vector<1x8x8xf32> to vector<8x8xf32>
    %cst_14 = arith.constant dense<0.000000e+00> : vector<8x256xf32>
    %20 = tpu.matmul %19, %16, %cst_14 {dimension_numbers = #tpu.dot_dimension_numbers<[1], [0], [0], [1], [0, 0, 1, 1], [], []>} : vector<8x8xf32>, vector<8x256xf32>, vector<8x256xf32> -> vector<8x256xf32>
    %c4_i32 = arith.constant 4 : i32
    %21 = arith.index_cast %c4_i32 : i32 to index
    %c0_15 = arith.constant 0 : index
    %c0_16 = arith.constant 0 : index
    %22 = vector.load %arg3[%21, %c0_15, %c0_16] : memref<8x8x8xf32, #tpu.memory_space<vmem>>, vector<1x8x8xf32>
    %23 = vector.shape_cast %22 : vector<1x8x8xf32> to vector<8x8xf32>
    %cst_17 = arith.constant dense<0.000000e+00> : vector<8x256xf32>
    %24 = tpu.matmul %23, %20, %cst_17 {dimension_numbers = #tpu.dot_dimension_numbers<[1], [0], [0], [1], [0, 0, 1, 1], [], []>} : vector<8x8xf32>, vector<8x256xf32>, vector<8x256xf32> -> vector<8x256xf32>
    %c5_i32 = arith.constant 5 : i32
    %25 = arith.index_cast %c5_i32 : i32 to index
    %c0_18 = arith.constant 0 : index
    %c0_19 = arith.constant 0 : index
    %26 = vector.load %arg3[%25, %c0_18, %c0_19] : memref<8x8x8xf32, #tpu.memory_space<vmem>>, vector<1x8x8xf32>
    %27 = vector.shape_cast %26 : vector<1x8x8xf32> to vector<8x8xf32>
    %cst_20 = arith.constant dense<0.000000e+00> : vector<8x256xf32>
    %28 = tpu.matmul %27, %24, %cst_20 {dimension_numbers = #tpu.dot_dimension_numbers<[1], [0], [0], [1], [0, 0, 1, 1], [], []>} : vector<8x8xf32>, vector<8x256xf32>, vector<8x256xf32> -> vector<8x256xf32>
    %c6_i32 = arith.constant 6 : i32
    %29 = arith.index_cast %c6_i32 : i32 to index
    %c0_21 = arith.constant 0 : index
    %c0_22 = arith.constant 0 : index
    %30 = vector.load %arg3[%29, %c0_21, %c0_22] : memref<8x8x8xf32, #tpu.memory_space<vmem>>, vector<1x8x8xf32>
    %31 = vector.shape_cast %30 : vector<1x8x8xf32> to vector<8x8xf32>
    %cst_23 = arith.constant dense<0.000000e+00> : vector<8x256xf32>
    %32 = tpu.matmul %31, %28, %cst_23 {dimension_numbers = #tpu.dot_dimension_numbers<[1], [0], [0], [1], [0, 0, 1, 1], [], []>} : vector<8x8xf32>, vector<8x256xf32>, vector<8x256xf32> -> vector<8x256xf32>
    %c7_i32 = arith.constant 7 : i32
    %33 = arith.index_cast %c7_i32 : i32 to index
    %c0_24 = arith.constant 0 : index
    %c0_25 = arith.constant 0 : index
    %34 = vector.load %arg3[%33, %c0_24, %c0_25] : memref<8x8x8xf32, #tpu.memory_space<vmem>>, vector<1x8x8xf32>
    %35 = vector.shape_cast %34 : vector<1x8x8xf32> to vector<8x8xf32>
    %cst_26 = arith.constant dense<0.000000e+00> : vector<8x256xf32>
    %36 = tpu.matmul %35, %32, %cst_26 {dimension_numbers = #tpu.dot_dimension_numbers<[1], [0], [0], [1], [0, 0, 1, 1], [], []>} : vector<8x8xf32>, vector<8x256xf32>, vector<8x256xf32> -> vector<8x256xf32>
    %c8_i32 = arith.constant 8 : i32
    %37 = vector.extract_strided_slice %36 {offsets = [0, 0], sizes = [4, 256], strides = [1, 1]} : vector<8x256xf32> to vector<4x256xf32>
    %cst_27 = arith.constant -1.000000e+00 : f32
    %cst_28 = arith.constant 1.000000e+00 : f32
    %38 = vector.broadcast %cst_27 : f32 to vector<4x256xf32>
    %39 = arith.maximumf %38, %37 : vector<4x256xf32>
    %40 = vector.broadcast %cst_28 : f32 to vector<4x256xf32>
    %41 = arith.minimumf %40, %39 : vector<4x256xf32>
    %c0_29 = arith.constant 0 : index
    %c0_30 = arith.constant 0 : index
    %c0_31 = arith.constant 0 : index
    %42 = vector.load %arg4[%c0_29, %c0_30, %c0_31] : memref<1x4x256xf32, #tpu.memory_space<vmem>>, vector<1x4x256xf32>
    %43 = vector.shape_cast %42 : vector<1x4x256xf32> to vector<4x256xf32>
    %44 = vector.shape_cast %41 : vector<4x256xf32> to vector<1x4x256xf32>
    tpu.vector_store %arg4[%c0_29, %c0_30, %c0_31], %44 {strides = array<i32>} : memref<1x4x256xf32, #tpu.memory_space<vmem>>, vector<1x4x256xf32>,
    return
  }
  func.func @transform_0(%arg0: i32, %arg1: i32) -> (i32, i32, i32) {
    %c0_i32 = arith.constant 0 : i32
    %c0_i32_0 = arith.constant 0 : i32
    return %arg0, %c0_i32, %arg1 : i32, i32, i32
  }
  func.func @transform_1(%arg0: i32, %arg1: i32) -> (i32, i32, i32) {
    %c0_i32 = arith.constant 0 : i32
    %c0_i32_0 = arith.constant 0 : i32
    %c0_i32_1 = arith.constant 0 : i32
    %c0_i32_2 = arith.constant 0 : i32
    return %c0_i32, %c0_i32_0, %c0_i32_1 : i32, i32, i32
  }
  func.func @transform_2(%arg0: i32, %arg1: i32) -> (i32, i32, i32) {
    %c0_i32 = arith.constant 0 : i32
    %c0_i32_0 = arith.constant 0 : i32
    return %arg0, %c0_i32, %arg1 : i32, i32, i32
  }
}

</mosaic_0001>

<bundles_post_ra>
// kernel: _veuler_sample_impl.1
= control target key start
LH: loop header
LB: loop body
LE: loop exit
PB: predicated region body
PF: predicated region fallthrough
CT: control target
= control target key end

     0   :  { %s756_s9 = smov 0   ;;  %s758_s10 = smov 0   ;;  %s839_s0 = inlined_call_operand.vmem [shape: f32[2,4,256], index: 0, kind: input, shape index: {}, may-alias: {0,2}]   ;;  %s840_s1 = inlined_call_operand.vmem [shape: f32[8,8,8], index: 1, kind: input, shape index: {}]   ;;  %s841_s2 = inlined_call_operand.vmem [shape: f32[2,4,256], index: 2, kind: output, shape index: {}, may-alias: {0,2}]  }
   0x1   :  { %s760_s11 = smov 0  }
   0x2 LB: > { %s24_s12 = sadd.s32 1, %s735_s10  ;;  %p657_p0 = scmp.ge.s32.totalorder %s739_s11, 1  ;;  %s739_s11 = sphi %s760_s11, %s12_s11   ;;  %s735_s10 = sphi %s758_s10, %s843_s10   ;;  %s731_s9 = sphi %s756_s9, %s842_s9  }
   0x3   : > { %p26_p1 = scmp.ge.s32.totalorder %s24_s12, 2  ;;  %p133_p2 = scmp.lt.s32.totalorder %s739_s11, 3 }
   0x5   : > { %s845_s12 = smov (%p26_p1, %s24_s12), 0  ;;  %p134_p3 = pnand %p657_p0, %p133_p2 }
   0x6   : > { %p164_p4 = scmp.lt.s32.totalorder (!%p134_p3), %s731_s9, 1 }
   0x7   : > { %137 = sbr.rel (%p134_p3) target bundleno = 1071 (0x42f), region = 28 }
   0xc   : > { %s847_s9 = smov (!%p164_p4, %s731_s9), 1  ;;  %vm190_vm0 = vcmask 1043456   ;;  %vm193_vm1 = vcmask 1044480   ;;  %v196_v1 = vld [vmem:[%s840_s1] sm:$0xff]  ;;  %vm197_vm2 = vcmask 64512   ;;  %v666_v6 = vld [vmem:[%s840_s1 + $0x8] sm:$0xff] }
   0xd   : > { %s691_s13 = sshll.u32 %s847_s9, 3  ;;  %v669_v9 = vld [vmem:[%s840_s1 + $0x10] sm:$0xff]  ;;  %v672_v12 = vld [vmem:[%s840_s1 + $0x18] sm:$0xff]  ;;  %v675_v15 = vld [vmem:[%s840_s1 + $0x20] sm:$0xff] }
   0xe   : > { %s171_s16 = scalar_lea.vmem %s839_s0, %s691_s13  ;;  %v678_v18 = vld [vmem:[%s840_s1 + $0x28] sm:$0xff]  ;;  %v681_v21 = vld [vmem:[%s840_s1 + $0x30] sm:$0xff]  ;;  %v684_v24 = vld [vmem:[%s840_s1 + $0x38] sm:$0xff]  ;;  %s181_s7 = scalar_lea.vmem %s841_s2, %s691_s13 }
   0xf   : > { %v183_v0 = vld [vmem:[%s171_s16] sm:$0xff] }
  0x10   : > { %185 = vst [vmem:[#allocation1] ss:$2 sm:$0xff] %v183_v0 }
  0x17   : > { %v187_v2 = vld.sshfl [vmem:[#allocation1 + $0x8] sm:$0xff pattern:$0x75316420]  ;;  %v186_v3 = vld.sshfl [vmem:[#allocation1] sm:$0xff pattern:$0x75316420] }
  0x18   : > { %v192_v4 = vsel %vm190_vm0, %v187_v2, 1.0  ;;  %v191_v5 = vsel %vm190_vm0, %v186_v3, 1.0 }
  0x19   : > { %664 = vmatpush.msk.msra.mxu1 %vm193_vm1, %v192_v4  ;;  %662 = vmatpush.msk.msra.mxu0 %vm193_vm1, %v191_v5 }
  0x1a   : > { %665 = vmatmul.msk.f32.vlgmr.msra.gmra.mxu1 %vm197_vm2, %v196_v1  ;;  %663 = vmatmul.msk.f32.vlgmr.msra.gmra.mxu0 %vm197_vm2, %v196_v1 }
  0x97   : > { %v238_v7 = vpop.f32.mrf.mxu1  ;;  %v218_v8 = vpop.f32.mrf.mxu0 }
  0x98   : > { %281 = vmatpush.msra.mxu3 %v238_v7  ;;  %261 = vmatpush.msra.mxu2 %v218_v8 }
  0x99   : > { %668 = vmatmul.msk.f32.vlgmr.msra.gmra.mxu3 %vm197_vm2, %v666_v6  ;;  %667 = vmatmul.msk.f32.vlgmr.msra.gmra.mxu2 %vm197_vm2, %v666_v6 }
 0x11c   : > { %v283_v10 = vpop.f32.mrf.mxu3  ;;  %v263_v11 = vpop.f32.mrf.mxu2 }
 0x11d   : > { %326 = vmatpush.msrb.mxu1 %v283_v10  ;;  %306 = vmatpush.msrb.mxu0 %v263_v11 }
 0x11e   : > { %671 = vmatmul.msk.f32.vlgmr.msrb.gmra.mxu1 %vm197_vm2, %v669_v9  ;;  %670 = vmatmul.msk.f32.vlgmr.msrb.gmra.mxu0 %vm197_vm2, %v669_v9 }
 0x19b   : > { %v328_v13 = vpop.f32.mrf.mxu1  ;;  %v308_v14 = vpop.f32.mrf.mxu0 }
 0x19c   : > { %371 = vmatpush.msrb.mxu3 %v328_v13  ;;  %351 = vmatpush.msrb.mxu2 %v308_v14 }
 0x19d   : > { %674 = vmatmul.msk.f32.vlgmr.msrb.gmra.mxu3 %vm197_vm2, %v672_v12  ;;  %673 = vmatmul.msk.f32.vlgmr.msrb.gmra.mxu2 %vm197_vm2, %v672_v12 }
 0x220   : > { %v373_v16 = vpop.f32.mrf.mxu3  ;;  %v353_v17 = vpop.f32.mrf.mxu2 }
 0x221   : > { %416 = vmatpush.msra.mxu1 %v373_v16  ;;  %396 = vmatpush.msra.mxu0 %v353_v17 }
 0x222   : > { %677 = vmatmul.msk.f32.vlgmr.msra.gmra.mxu1 %vm197_vm2, %v675_v15  ;;  %676 = vmatmul.msk.f32.vlgmr.msra.gmra.mxu0 %vm197_vm2, %v675_v15 }
 0x29f   : > { %v418_v19 = vpop.f32.mrf.mxu1  ;;  %v398_v20 = vpop.f32.mrf.mxu0 }
 0x2a0   : > { %461 = vmatpush.msra.mxu3 %v418_v19  ;;  %441 = vmatpush.msra.mxu2 %v398_v20 }
 0x2a1   : > { %680 = vmatmul.msk.f32.vlgmr.msra.gmra.mxu3 %vm197_vm2, %v678_v18  ;;  %679 = vmatmul.msk.f32.vlgmr.msra.gmra.mxu2 %vm197_vm2, %v678_v18 }
 0x324   : > { %v463_v22 = vpop.f32.mrf.mxu3  ;;  %v443_v23 = vpop.f32.mrf.mxu2 }
 0x325   : > { %506 = vmatpush.msrb.mxu1 %v463_v22  ;;  %486 = vmatpush.msrb.mxu0 %v443_v23 }
 0x326   : > { %683 = vmatmul.msk.f32.vlgmr.msrb.gmra.mxu1 %vm197_vm2, %v681_v21  ;;  %682 = vmatmul.msk.f32.vlgmr.msrb.gmra.mxu0 %vm197_vm2, %v681_v21 }
 0x3a3   : > { %v508_v25 = vpop.f32.mrf.mxu1  ;;  %v488_v26 = vpop.f32.mrf.mxu0 }
 0x3a4   : > { %551 = vmatpush.msrb.mxu3 %v508_v25  ;;  %531 = vmatpush.msrb.mxu2 %v488_v26 }
 0x3a5   : > { %686 = vmatmul.msk.f32.vlgmr.msrb.gmra.mxu3 %vm197_vm2, %v684_v24  ;;  %685 = vmatmul.msk.f32.vlgmr.msrb.gmra.mxu2 %vm197_vm2, %v684_v24 }
 0x428   : > { %v553_v27 = vpop.f32.mrf.mxu3  ;;  %v533_v28 = vpop.f32.mrf.mxu2 }
 0x429   : > { %v688_v29 = vclamps-f32 %v553_v27, 1.0  ;;  %v687_v30 = vclamps-f32 %v533_v28, 1.0 }
 0x42b   : > { %v562_v31 = vrot.slane %v688_v29, 4 }
 0x42d   : > { %v563_v32 = vsel %vm190_vm0, %v687_v30, %v562_v31 }
 0x42e   : > { %565 = vst [vmem:[%s181_s7] sm:$0xff] %v563_v32 }
 0x42f PF: > { %s12_s11 = sadd.s32 1, %s739_s11   ;;  %s842_s9 = smov %s735_s10 }
 0x430   : > { %p9_p5 = scmp.ge.s32.totalorder %s12_s11, 4   ;;  %s843_s10 = smov %s845_s12 }
 0x432   :  { %11 = sbr.rel (!%p9_p5) target bundleno = 2 (0x2), region = 65 }

</bundles_post_ra>
